<compile_context>
chip_gen: v7x
topology: tpu7x:2x2x1
jax: 0.10.0
libtpu: 0.0.40
codegen_flags: <defaults>
</compile_context>

<pallas_src>
import functools

import jax
import jax.numpy as jnp
from jax.experimental import pallas as pl
from jax.experimental.pallas import tpu as pltpu


def _round_up(v, m):
    return (v + m - 1) // m * m


def lora_kernel(x_ref, wa_ref, wb_ref, o_ref, h_ref, *, alpha):
    # First matmul (x @ W_a, the expensive one when in_dim >> rank) runs only
    # once per row-tile; its result is carried in VMEM scratch across all
    # out_dim tiles of that row-tile.
    @pl.when(pl.program_id(1) == 0)
    def _():
        h_ref[...] = (
            jnp.dot(x_ref[...], wa_ref[...], preferred_element_type=jnp.float32)
            * alpha
        )

    # Second MXU matmul consumes the f32 intermediate directly (no downcast).
    o_ref[...] = jnp.dot(
        h_ref[...], wb_ref[...], preferred_element_type=jnp.float32
    ).astype(o_ref.dtype)


def lora_forward(x, w_a, w_b, alpha, *, block_m=512, block_n=1024):
    """Pallas LoRA forward: out = ((alpha * x) @ W_a) @ W_b.

    Tiles x as (TM, in_dim) and out as (TM, TN); W_a stays resident in VMEM,
    W_b is tiled along out_dim only, and the rank contraction is never
    gridded. Default tiles (512 x 1024 f32) fit inside the default 32 MiB
    scoped VMEM on all generations for typical in_dim; shrink block_m or raise
    vmem_limit_bytes for very large in_dim.
    """
    batch, in_dim = x.shape
    rank = w_a.shape[1]
    out_dim = w_b.shape[1]
    assert w_a.shape == (in_dim, rank)
    assert w_b.shape == (rank, out_dim)

    out_dtype = x.dtype

    # --- lane/sublane-aligned tiles; pad M / N in the wrapper if needed ----
    # M tile: multiple of the sublane count (8), no larger than needed.
    tm = min(block_m, _round_up(batch, 8))
    m_pad = _round_up(batch, tm)
    # N tile: lane-dense (multiple of 128) so output stores are unmasked.
    n128 = _round_up(out_dim, 128)
    tn = min(block_n, n128)
    n_pad = _round_up(n128, tn)

    x_p = x if m_pad == batch else jnp.pad(x, ((0, m_pad - batch), (0, 0)))
    w_b_p = (
        w_b
        if n_pad == out_dim
        else jnp.pad(w_b, ((0, 0), (0, n_pad - out_dim)))
    )

    grid = (m_pad // tm, n_pad // tn)
    kernel = functools.partial(lora_kernel, alpha=float(alpha))

    out_padded = pl.pallas_call(
        kernel,
        out_shape=jax.ShapeDtypeStruct((m_pad, n_pad), out_dtype),
        grid_spec=pltpu.PrefetchScalarGridSpec(
            num_scalar_prefetch=0,
            grid=grid,
            in_specs=[
                pl.BlockSpec((tm, in_dim), lambda i, j: (i, 0)),    # x row-tile
                pl.BlockSpec((in_dim, rank), lambda i, j: (0, 0)),  # W_a resident
                pl.BlockSpec((rank, tn), lambda i, j: (0, j)),      # W_b N-tile
            ],
            out_specs=pl.BlockSpec((tm, tn), lambda i, j: (i, j)),
            # Per-row-tile low-rank intermediate, reused across all N tiles.
            scratch_shapes=[pltpu.VMEM((tm, rank), jnp.float32)],
        ),
        compiler_params=pltpu.CompilerParams(
            # Row-tiles are independent -> megacore sharding on v7x; the N
            # axis carries the h scratch, so it must stay "arbitrary".
            dimension_semantics=("parallel", "arbitrary"),
        ),
    )(x_p, w_a, w_b_p)

    if m_pad != batch or n_pad != out_dim:
        out_padded = out_padded[:batch, :out_dim]
    return out_padded


if __name__ == "__main__":
    # Small shapes consistent with the module: batch=8, in_dim=32, rank=8, out_dim=64
    batch, in_dim, rank, out_dim = 8, 32, 8, 64
    alpha = 2.0

    key = jax.random.PRNGKey(0)
    kx, ka, kb = jax.random.split(key, 3)

    x = jax.random.normal(kx, (batch, in_dim), dtype=jnp.float32)

    # Deterministic parameter init (shapes per LoRALayer.__init__):
    #   W_a = randn(in_dim, rank) / sqrt(rank)
    #   W_b = zeros(rank, out_dim) in the original module; randomized here so
    #         the numerical check against the reference is non-trivial.
    std_dev = 1.0 / jnp.sqrt(jnp.float32(rank))
    w_a = jax.random.normal(ka, (in_dim, rank), dtype=jnp.float32) * std_dev
    w_b = jax.random.normal(kb, (rank, out_dim), dtype=jnp.float32) * 0.05

    out = lora_forward(x, w_a, w_b, alpha)
    out = jax.block_until_ready(out)

    # Pure-JAX reference of the PyTorch forward: alpha * x @ W_a @ W_b
    ref = (alpha * x) @ w_a @ w_b
    assert out.shape == (batch, out_dim)
    assert jnp.allclose(out, ref, atol=1e-5, rtol=1e-5), "mismatch vs reference"

    print("KERNEL_OK")
</pallas_src>

<mosaic_0001>
module attributes {stable_mosaic.version = 11 : i64} {
  func.func @lora_kernel(%arg0: i32, %arg1: i32, %arg2: memref<8x32xf32, #tpu.memory_space<vmem>>, %arg3: memref<32x8xf32, #tpu.memory_space<vmem>>, %arg4: memref<8x128xf32, #tpu.memory_space<vmem>>, %arg5: memref<8x128xf32, #tpu.memory_space<vmem>>, %arg6: memref<8x8xf32, #tpu.memory_space<vmem>>) attributes {dimension_semantics = [#tpu.dimension_semantics<parallel>, #tpu.dimension_semantics<arbitrary>], iteration_bounds = array<i64: 1, 1>, scalar_prefetch = 0 : i64, scratch_operands = 1 : i64, tpu.core_type = #tpu.core_type<tc>, window_params = [{transform_indices = @transform_0, window_bounds = array<i64: 8, 32>}, {pipeline_mode = #tpu.pipeline_mode<synchronous>, transform_indices = @transform_1, window_bounds = array<i64: 32, 8>}, {transform_indices = @transform_2, window_bounds = array<i64: 8, 128>}, {transform_indices = @transform_3, window_bounds = array<i64: 8, 128>}]} {
    %c0_i32 = arith.constant 0 : i32
    %0 = arith.cmpi eq, %arg1, %c0_i32 : i32
    %1 = arith.extui %0 : i1 to i32
    %c0_i32_0 = arith.constant 0 : i32
    %2 = arith.cmpi ne, %1, %c0_i32_0 : i32
    scf.if %2 {
      %c0_6 = arith.constant 0 : index
      %c0_7 = arith.constant 0 : index
      %7 = vector.load %arg2[%c0_6, %c0_7] : memref<8x32xf32, #tpu.memory_space<vmem>>, vector<8x32xf32>
      %c0_8 = arith.constant 0 : index
      %c0_9 = arith.constant 0 : index
      %8 = vector.load %arg3[%c0_8, %c0_9] : memref<32x8xf32, #tpu.memory_space<vmem>>, vector<32x8xf32>
      %cst_10 = arith.constant dense<0.000000e+00> : vector<8x8xf32>
      %9 = tpu.matmul %7, %8, %cst_10 {dimension_numbers = #tpu.dot_dimension_numbers<[1], [0], [0], [1], [0, 0, 1, 1], [], []>} : vector<8x32xf32>, vector<32x8xf32>, vector<8x8xf32> -> vector<8x8xf32>
      %cst_11 = arith.constant 2.000000e+00 : f32
      %10 = vector.broadcast %cst_11 : f32 to vector<8x8xf32>
      %11 = arith.mulf %9, %10 : vector<8x8xf32>
      %c0_12 = arith.constant 0 : index
      %c0_13 = arith.constant 0 : index
      %12 = vector.load %arg6[%c0_12, %c0_13] : memref<8x8xf32, #tpu.memory_space<vmem>>, vector<8x8xf32>
      tpu.vector_store %arg6[%c0_12, %c0_13], %11 {strides = array<i32>} : memref<8x8xf32, #tpu.memory_space<vmem>>, vector<8x8xf32>,
    } else {
    }
    %c0 = arith.constant 0 : index
    %c0_1 = arith.constant 0 : index
    %3 = vector.load %arg6[%c0, %c0_1] : memref<8x8xf32, #tpu.memory_space<vmem>>, vector<8x8xf32>
    %c0_2 = arith.constant 0 : index
    %c0_3 = arith.constant 0 : index
    %4 = vector.load %arg4[%c0_2, %c0_3] : memref<8x128xf32, #tpu.memory_space<vmem>>, vector<8x128xf32>
    %cst = arith.constant dense<0.000000e+00> : vector<8x128xf32>
    %5 = tpu.matmul %3, %4, %cst {dimension_numbers = #tpu.dot_dimension_numbers<[1], [0], [0], [1], [0, 0, 1, 1], [], []>} : vector<8x8xf32>, vector<8x128xf32>, vector<8x128xf32> -> vector<8x128xf32>
    %c0_4 = arith.constant 0 : index
    %c0_5 = arith.constant 0 : index
    %6 = vector.load %arg5[%c0_4, %c0_5] : memref<8x128xf32, #tpu.memory_space<vmem>>, vector<8x128xf32>
    tpu.vector_store %arg5[%c0_4, %c0_5], %5 {strides = array<i32>} : memref<8x128xf32, #tpu.memory_space<vmem>>, vector<8x128xf32>,
    return
  }
  func.func @transform_0(%arg0: i32, %arg1: i32) -> (i32, i32) {
    %c0_i32 = arith.constant 0 : i32
    %c0_i32_0 = arith.constant 0 : i32
    return %arg0, %c0_i32 : i32, i32
  }
  func.func @transform_1(%arg0: i32, %arg1: i32) -> (i32, i32) {
    %c0_i32 = arith.constant 0 : i32
    %c0_i32_0 = arith.constant 0 : i32
    %c0_i32_1 = arith.constant 0 : i32
    return %c0_i32, %c0_i32_0 : i32, i32
  }
  func.func @transform_2(%arg0: i32, %arg1: i32) -> (i32, i32) {
    %c0_i32 = arith.constant 0 : i32
    %c0_i32_0 = arith.constant 0 : i32
    return %c0_i32, %arg1 : i32, i32
  }
  func.func @transform_3(%arg0: i32, %arg1: i32) -> (i32, i32) {
    %c0_i32 = arith.constant 0 : i32
    return %arg0, %arg1 : i32, i32
  }
}

</mosaic_0001>

<bundles_post_ra>
// kernel: tpu_custom_call.1
= control target key start
LH: loop header
LB: loop body
LE: loop exit
PB: predicated region body
PF: predicated region fallthrough
CT: control target
= control target key end

     0   :  { %v251_v3 = vmov 0.0|0.0   ;;  %vm252_vm0 = vmmov 0   ;;  %v253_v6 = vmov 0.0   ;;  %s305_s0 = inlined_call_operand.vmem [shape: f32[8,32], index: 0, kind: input, shape index: {}]   ;;  %s306_s1 = inlined_call_operand.vmem [shape: f32[32,8], index: 1, kind: input, shape index: {}]   ;;  %s307_s2 = inlined_call_operand.vmem [shape: f32[8,128], index: 2, kind: input, shape index: {}]   ;;  %s308_s3 = inlined_call_operand.hbm [shape: f32[8,128], index: 3, kind: output, shape index: {}]  }
   0x1   :  { %v20_v0 = vld [vmem:[%s306_s1] sm:$0xff]  ;;  %v21_v1 = vld [vmem:[%s306_s1 + $0x8] sm:$0xff]  ;;  %v22_v2 = vld [vmem:[%s306_s1 + $0x10] sm:$0xff]  ;;  %217 = vmatprep.subr.bf16.mxu0 %v251_v3  ;;  %209 = vmatprep.mubr.msk.f32.mxu0 %vm252_vm0, %v253_v6 }
   0x2   :  { %v218_v4 = vpack.c.bf16 %v21_v1, %v20_v0  ;;  %v23_v5 = vld [vmem:[%s306_s1 + $0x18] sm:$0xff] }
   0x3   :  { %8 = vsyncpa [#allocation4], 0  ;;  %212 = vmatprep.subr.mxu1 %v253_v6  ;;  %214 = vmatprep.mubr.msk.f32.mxu1 %vm252_vm0, %v253_v6  ;;  %v221_v7 = vpack.c.bf16 %v23_v5, %v22_v2  ;;  %v19_v8 = vld [vmem:[%s305_s0] sm:$0xff]  ;;  %vm24_vm1 = vcmask 261120   ;;  %vm99_vm2 = vcmask 64512   ;;  %s254_s1 = smov [#allocation3]  }
   0x4   :  { %219 = vmatpush3.bf16.msra.mxu0 %v218_v4  ;;  %v102_v9 = vld [vmem:[%s307_s2] sm:$0xff]  ;;  %s184_s24 = sshll.u32 %s254_s1, 4  ;;  %s185_s24 = int_to_ptr.vmem [resolvable:$true] %s184_s24 }
   0x5   :  { %220 = vmatprep.subr.bf16.mxu0 %v251_v3  ;;  %213 = vmatpush3.msra.mxu1 %v102_v9  ;;  %s227_s0 = scalar_lea.vmem %s185_s24, 128  ;;  %p232_p1 = scmp.lt.s32.totalorder %s185_s24, %s185_s24 }
   0x6   :  { %p228_p0 = scmp.ne.s32.totalorder %s185_s24, %s227_s0  ;;  %p233_p2 = scmp.lt.s32.totalorder %s227_s0, %s227_s0 }
   0x8   :  { %222 = vmatpush3.bf16.msra.mxu0 %v221_v7  ;;  %p234_p3 = por %p233_p2, %p232_p1 }
   0xa   :  { %p235_p4 = pnand %p234_p3, %p228_p0 }
   0xb   :  { %210 = vmatmul.mubr.msk.f32.vlgmr.msra.gmra.mrb[0].mxu0 %vm24_vm1, %v19_v8 }
  0xde   :  { %v94_v10 = vpop.f32.mrb[0].mxu0 }
  0xdf   :  { %v98_v11 = vmul.f32 2.0, %v94_v10  ;;  %v211_v12 = vpop.f32.mrb[1].mxu0 }
  0xe1   :  { %100 = vst.msk [vmem:[#allocation2] sm:$0xff] %vm99_vm2, %v98_v11 }
  0xe8   :  { %v101_v13 = vld [vmem:[#allocation2] sm:$0xff] }
  0xe9   :  { %215 = vmatmul.mubr.msk.f32.vlgmr.msra.gmra.mrb[0].mxu1 %vm99_vm2, %v101_v13 }
 0x1bc   :  { %v173_v14 = vpop.f32.mrb[0].mxu1 }
 0x1bd   :  { %177 = vst [vmem:[#allocation3] sm:$0xff] %v173_v14  ;;  %v216_v15 = vpop.f32.mrb[1].mxu1 }
 0x1be   :  { %238 = shalt.err (!%p235_p4)
}
 0x1bf   :  { %s239_s26 = scalar_lea.hbm %s308_s3, 128 }
 0x1c0   :  { %p240_p5 = scmp.ne.s32.totalorder %s308_s3, %s239_s26  ;;  %p243_p6 = scmp.lt.u32.totalorder %s239_s26, %s308_s3 }
 0x1c2   :  { %p245_p7 = pnand %p243_p6, %p240_p5 }
 0x1c4   :  { %248 = shalt.err (!%p245_p7)
}
 0x1c5   :  { %187 = dma.vmem_to_hbm [thread:$0]  %s185_s24, 128, %s308_s3, [#allocation4]  }
 0x1c6   :  { %249 = dma.done.wait [#allocation4], 128  }
 0x1c7   :  { %250 = vsyncadd [#allocation4], 4294967168 }
 0x1c8   :  { %191 = vsyncpa [#allocation4], 1 }

</bundles_post_ra>
